<compile_context>
chip_gen: v7x
topology: tpu7x:2x2x1
jax: 0.10.0
libtpu: 0.0.40
codegen_flags: <defaults>
</compile_context>

<pallas_src>
import jax
import jax.numpy as jnp
from jax.experimental import pallas as pl
from jax.experimental.pallas import tpu as pltpu

_MIB = 1024 * 1024


def _tpu_vmem_info():
    """Returns (scoped_vmem_budget, vmem_hard_cap, multi_tensorcore)."""
    try:
        cap = int(pltpu.get_tpu_info().vmem_capacity_bytes)
    except Exception:
        cap = 64 * _MIB  # conservative (v7x-sized) fallback if query unavailable
    if cap >= 96 * _MIB:
        # v5e / v6e class: 128 MiB VMEM, single TensorCore per chip.
        return 56 * _MIB, max(cap - 16 * _MIB, 16 * _MIB), False
    # v7x class: 64 MiB VMEM per TensorCore, 2 TensorCores per chip.
    return 24 * _MIB, max(cap - 12 * _MIB, 16 * _MIB), True


def _pick_tile_w(W, per_col_bytes, budget, multi_tc):
    """Column-slab width tw along W.

    Constraints: tw == W (single slab) or tw a 128-multiple divisor of W
    (BlockSpec (8,128) rule on both the (.., H, tw) and (.., tw, W) views).
    Footprint per grid step ~ 9 * per_col_bytes * tw (3 streams x 2 buffers
    + f32 temporaries), kept under `budget`.
    """
    if W % 128 != 0 or W < 256:
        return W  # single full-width slab (fast path for small spatial dims)
    cap_cols = max(128, budget // (9 * max(per_col_bytes, 1)))
    divs = [t for t in range(128, W + 1, 128) if W % t == 0 and t <= cap_cols]
    if not divs:
        return 128  # smallest legal tile; vmem_limit is raised to cover it
    if multi_tc:
        even = [t for t in divs if (W // t) >= 2 and (W // t) % 2 == 0]
        if even:
            return max(even)
        two = [t for t in divs if (W // t) >= 2]
        if two:
            return max(two)
    return max(divs)


def _psa_block_compute(xa_val, xm_val, wb_val, o_ref):
    """Fused per-slab PSA.

    xa_val: (B, C, tw, W) slab of x used to compute att at pixels (w' in tile, all h)
    xm_val: (B, C, H, tw) slab of x to be scaled (all h, w in tile)
    wb_val: (1, C+1, 1, 1) rows 0..C-1 = mean(W, axis=0), row C = mean(bias)
    o_ref : (B, C, H, tw)
    """
    B = xm_val.shape[0]
    C = xm_val.shape[1]

    wb = wb_val.astype(jnp.float32)                 # (1, C+1, 1, 1)
    w_col = wb[:, :C]                               # (1, C, 1, 1)
    b_mean = wb[:, C:]                              # (1, 1, 1, 1)

    # Attention math in f32 (cheap: only the att slab is upcast; no-op for f32 x).
    xa = xa_val.astype(jnp.float32)                                   # (B, C, tw, W)
    s = jnp.mean(xa, axis=1, keepdims=True)                           # mean_c x
    s2 = jnp.sum(xa * w_col, axis=1, keepdims=True) + b_mean          # mean_c conv1x1(x)

    # nn.Softmax2d on a 3-D (B, H, W) input -> softmax over dim -3 (the BATCH axis),
    # which is pointwise per pixel, so it is safe per slab.
    diff = s2 - s
    m = jnp.max(diff, axis=0, keepdims=True)
    e = jnp.exp(diff - m)
    raise_sp = e / jnp.sum(e, axis=0, keepdims=True)
    att = jax.nn.sigmoid(s2 + s2 * raise_sp)                          # (B, 1, tw, W): att[b, w', h]

    # einsum 'bchw,bwh->bchw': out[b,c,h,w] = x[b,c,h,w] * att[b,w,h]
    # -> transpose the tiny att tile in-kernel (XLU; per-batch 2-D transposes).
    att3 = att[:, 0]                                                  # (B, tw, W)
    att_t = jnp.stack([att3[b].T for b in range(B)])                  # (B, W, tw) == (B, H, tw)

    # Single dense full-tile store; multiply in x's dtype (bf16 stays bf16).
    o_ref[...] = xm_val * att_t[:, None, :, :].astype(xm_val.dtype)


def psa_single_kernel(x_ref, wb_ref, o_ref):
    """Whole image resident in VMEM: x is read exactly once."""
    xv = x_ref[...]
    _psa_block_compute(xv, xv, wb_ref[...], o_ref)


def psa_tiled_kernel(x_att_ref, x_mul_ref, wb_ref, o_ref):
    """Column-slab tiling: two views of x (att slab + mul slab) per grid step."""
    _psa_block_compute(x_att_ref[...], x_mul_ref[...], wb_ref[...], o_ref)


def psa_forward(x, weight, bias):
    """x: (B, C, H, W); weight: (Cout, Cin); bias: (Cout,). Returns (B, C, H, W)."""
    B, C, H, W = x.shape
    assert H == W, "einsum 'bchw,bwh->bchw' requires square spatial dims"

    # Fold the 1x1 conv: mean over output channels of (W @ x + b).
    w_eff = jnp.mean(weight.astype(jnp.float32), axis=0)              # (C,)
    b_mean = jnp.mean(bias.astype(jnp.float32))                       # ()
    wb = jnp.concatenate([w_eff, b_mean[None]], axis=0).reshape(1, C + 1, 1, 1)

    budget, hard_cap, multi_tc = _tpu_vmem_info()
    itemsize = x.dtype.itemsize
    per_col_bytes = B * C * H * itemsize
    tw = _pick_tile_w(W, per_col_bytes, budget, multi_tc)
    steps = W // tw

    # Explicit scoped-VMEM limit matched to the tile heuristic (with headroom).
    est = 9 * B * C * H * max(itemsize, 4) * tw
    vmem_limit = int(min(hard_cap, max(budget, est)))
    # TODO(synk): for very large images with W % 128 != 0 the single-slab fallback
    # may exceed VMEM; would need spatial padding to a 128-multiple (or a two-pass
    # att-through-HBM variant) to tile such shapes.

    x_bytes = x.size * itemsize
    P = H * W
    n_x_streams = 1 if steps == 1 else 2
    cost = pl.CostEstimate(
        flops=int(B * P * (4 * C + 8)),
        transcendentals=int(3 * B * P),
        bytes_accessed=int((n_x_streams + 1) * x_bytes + (C + 1) * 4),
    )
    cparams = pltpu.CompilerParams(
        dimension_semantics=("parallel",),
        vmem_limit_bytes=vmem_limit,
    )
    out_shape = jax.ShapeDtypeStruct((B, C, H, W), x.dtype)
    wb_spec = pl.BlockSpec((1, C + 1, 1, 1), lambda i: (0, 0, 0, 0))

    if steps == 1:
        # Fast path: whole x fits the budget -> one read + one write of x.
        return pl.pallas_call(
            psa_single_kernel,
            out_shape=out_shape,
            grid=(1,),
            in_specs=[
                pl.BlockSpec((B, C, H, W), lambda i: (0, 0, 0, 0)),
                wb_spec,
            ],
            out_specs=pl.BlockSpec((B, C, H, W), lambda i: (0, 0, 0, 0)),
            compiler_params=cparams,
            cost_estimate=cost,
        )(x, wb)

    # General path: 1-D grid over W column-slabs, two views of x per step.
    return pl.pallas_call(
        psa_tiled_kernel,
        out_shape=out_shape,
        grid=(steps,),
        in_specs=[
            pl.BlockSpec((B, C, tw, W), lambda i: (0, 0, i, 0)),   # att slab (rows w' in tile)
            pl.BlockSpec((B, C, H, tw), lambda i: (0, 0, 0, i)),   # mul slab (cols w in tile)
            wb_spec,
        ],
        out_specs=pl.BlockSpec((B, C, H, tw), lambda i: (0, 0, 0, i)),
        compiler_params=cparams,
        cost_estimate=cost,
    )(x, x, wb)


def psa_reference(x, weight, bias):
    """Pure-JAX mirror of the PyTorch forward (for verification)."""
    s = jnp.mean(x, axis=1)                                            # (B, H, W)
    xp = jnp.einsum('oc,bchw->bohw', weight, x,
                    precision=jax.lax.Precision.HIGHEST) + bias[None, :, None, None]
    s_ = jnp.mean(xp, axis=1)                                          # (B, H, W)
    raise_sp = jax.nn.softmax(s_ - s, axis=0)                          # Softmax2d: dim -3 = batch
    att = jax.nn.sigmoid(s_ + s_ * raise_sp)                           # (B, H, W)
    return jnp.einsum('bchw,bwh->bchw', x, att)


if __name__ == "__main__":
    key = jax.random.PRNGKey(0)
    k_x, k_w, k_b = jax.random.split(key, 3)

    B, C, H, W = 2, 4, 16, 16
    x = jax.random.normal(k_x, (B, C, H, W), jnp.float32)
    # Deterministic synthetic Conv2d(dim, dim, 1) parameters (weight squeezed to (Cout, Cin)).
    weight = jax.random.normal(k_w, (C, C), jnp.float32) * (1.0 / jnp.sqrt(C))
    bias = jax.random.normal(k_b, (C,), jnp.float32) * 0.1

    out = psa_forward(x, weight, bias)
    out = jax.block_until_ready(out)

    ref = psa_reference(x, weight, bias)
    assert out.shape == (B, C, H, W)
    max_err = float(jnp.max(jnp.abs(out - ref)))
    assert jnp.allclose(out, ref, atol=1e-4, rtol=1e-4), f"max abs err = {max_err}"
    print("KERNEL_OK")
</pallas_src>

<mosaic_0001>
module attributes {stable_mosaic.version = 11 : i64} {
  func.func @psa_single_kernel(%arg0: i32, %arg1: memref<2x4x16x16xf32, #tpu.memory_space<vmem>>, %arg2: memref<1x5x1x1xf32, #tpu.memory_space<vmem>>, %arg3: memref<2x4x16x16xf32, #tpu.memory_space<vmem>>) attributes {dimension_semantics = [#tpu.dimension_semantics<parallel>], iteration_bounds = array<i64: 1>, scalar_prefetch = 0 : i64, scratch_operands = 0 : i64, tpu.core_type = #tpu.core_type<tc>, window_params = [{pipeline_mode = #tpu.pipeline_mode<synchronous>, transform_indices = @transform_0, window_bounds = array<i64: 2, 4, 16, 16>}, {pipeline_mode = #tpu.pipeline_mode<synchronous>, transform_indices = @transform_1, window_bounds = array<i64: 1, 5, 1, 1>}, {pipeline_mode = #tpu.pipeline_mode<synchronous>, transform_indices = @transform_2, window_bounds = array<i64: 2, 4, 16, 16>}]} {
    %c0 = arith.constant 0 : index
    %c0_0 = arith.constant 0 : index
    %c0_1 = arith.constant 0 : index
    %c0_2 = arith.constant 0 : index
    %0 = vector.load %arg1[%c0, %c0_0, %c0_1, %c0_2] : memref<2x4x16x16xf32, #tpu.memory_space<vmem>>, vector<2x4x16x16xf32>
    %c0_3 = arith.constant 0 : index
    %c0_4 = arith.constant 0 : index
    %c0_5 = arith.constant 0 : index
    %c0_6 = arith.constant 0 : index
    %1 = vector.load %arg2[%c0_3, %c0_4, %c0_5, %c0_6] : memref<1x5x1x1xf32, #tpu.memory_space<vmem>>, vector<1x5x1x1xf32>
    %2 = vector.extract_strided_slice %1 {offsets = [0, 0, 0, 0], sizes = [1, 4, 1, 1], strides = [1, 1, 1, 1]} : vector<1x5x1x1xf32> to vector<1x4x1x1xf32>
    %3 = vector.extract_strided_slice %1 {offsets = [0, 4, 0, 0], sizes = [1, 1, 1, 1], strides = [1, 1, 1, 1]} : vector<1x5x1x1xf32> to vector<1x1x1x1xf32>
    %cst = arith.constant dense<0.000000e+00> : vector<2x16x16xf32>
    %4 = vector.multi_reduction <add>, %0, %cst [1] : vector<2x4x16x16xf32> to vector<2x16x16xf32>
    %5 = vector.shape_cast %4 : vector<2x16x16xf32> to vector<2x1x16x16xf32>
    %cst_7 = arith.constant 4.000000e+00 : f32
    %6 = vector.broadcast %cst_7 : f32 to vector<2x1x16x16xf32>
    %7 = arith.divf %5, %6 : vector<2x1x16x16xf32>
    %8 = vector.broadcast %2 : vector<1x4x1x1xf32> to vector<2x4x16x16xf32>
    %9 = arith.mulf %0, %8 : vector<2x4x16x16xf32>
    %cst_8 = arith.constant dense<0.000000e+00> : vector<2x16x16xf32>
    %10 = vector.multi_reduction <add>, %9, %cst_8 [1] : vector<2x4x16x16xf32> to vector<2x16x16xf32>
    %11 = vector.shape_cast %10 : vector<2x16x16xf32> to vector<2x1x16x16xf32>
    %12 = vector.broadcast %3 : vector<1x1x1x1xf32> to vector<2x1x16x16xf32>
    %13 = arith.addf %11, %12 : vector<2x1x16x16xf32>
    %14 = arith.subf %13, %7 : vector<2x1x16x16xf32>
    %cst_9 = arith.constant dense<0xFF800000> : vector<1x16x16xf32>
    %15 = vector.multi_reduction <maximumf>, %14, %cst_9 [0] : vector<2x1x16x16xf32> to vector<1x16x16xf32>
    %16 = vector.shape_cast %15 : vector<1x16x16xf32> to vector<1x1x16x16xf32>
    %17 = vector.broadcast %16 : vector<1x1x16x16xf32> to vector<2x1x16x16xf32>
    %18 = arith.subf %14, %17 : vector<2x1x16x16xf32>
    %19 = math.exp %18 : vector<2x1x16x16xf32>
    %cst_10 = arith.constant dense<0.000000e+00> : vector<1x16x16xf32>
    %20 = vector.multi_reduction <add>, %19, %cst_10 [0] : vector<2x1x16x16xf32> to vector<1x16x16xf32>
    %21 = vector.shape_cast %20 : vector<1x16x16xf32> to vector<1x1x16x16xf32>
    %22 = vector.broadcast %21 : vector<1x1x16x16xf32> to vector<2x1x16x16xf32>
    %23 = arith.divf %19, %22 : vector<2x1x16x16xf32>
    %24 = arith.mulf %13, %23 : vector<2x1x16x16xf32>
    %25 = arith.addf %13, %24 : vector<2x1x16x16xf32>
    %26 = arith.negf %25 : vector<2x1x16x16xf32>
    %27 = math.exp %26 : vector<2x1x16x16xf32>
    %cst_11 = arith.constant 1.000000e+00 : f32
    %28 = vector.broadcast %cst_11 : f32 to vector<2x1x16x16xf32>
    %29 = arith.addf %28, %27 : vector<2x1x16x16xf32>
    %30 = arith.divf %28, %29 : vector<2x1x16x16xf32>
    %31 = vector.shape_cast %30 : vector<2x1x16x16xf32> to vector<2x16x16xf32>
    %32 = vector.extract_strided_slice %31 {offsets = [0, 0, 0], sizes = [1, 16, 16], strides = [1, 1, 1]} : vector<2x16x16xf32> to vector<1x16x16xf32>
    %33 = vector.shape_cast %32 : vector<1x16x16xf32> to vector<16x16xf32>
    %34 = tpu.transpose %33, [1, 0] : vector<16x16xf32> -> vector<16x16xf32>
    %35 = vector.extract_strided_slice %31 {offsets = [1, 0, 0], sizes = [1, 16, 16], strides = [1, 1, 1]} : vector<2x16x16xf32> to vector<1x16x16xf32>
    %36 = vector.shape_cast %35 : vector<1x16x16xf32> to vector<16x16xf32>
    %37 = tpu.transpose %36, [1, 0] : vector<16x16xf32> -> vector<16x16xf32>
    %38 = vector.shape_cast %34 : vector<16x16xf32> to vector<1x16x16xf32>
    %39 = vector.shape_cast %37 : vector<16x16xf32> to vector<1x16x16xf32>
    %40 = tpu.concatenate %38, %39 in 0 : vector<1x16x16xf32>, vector<1x16x16xf32> -> vector<2x16x16xf32>
    %41 = vector.shape_cast %40 : vector<2x16x16xf32> to vector<2x1x16x16xf32>
    %42 = vector.broadcast %41 : vector<2x1x16x16xf32> to vector<2x4x16x16xf32>
    %43 = arith.mulf %0, %42 : vector<2x4x16x16xf32>
    %c0_12 = arith.constant 0 : index
    %c0_13 = arith.constant 0 : index
    %c0_14 = arith.constant 0 : index
    %c0_15 = arith.constant 0 : index
    %44 = vector.load %arg3[%c0_12, %c0_13, %c0_14, %c0_15] : memref<2x4x16x16xf32, #tpu.memory_space<vmem>>, vector<2x4x16x16xf32>
    tpu.vector_store %arg3[%c0_12, %c0_13, %c0_14, %c0_15], %43 {strides = array<i32>} : memref<2x4x16x16xf32, #tpu.memory_space<vmem>>, vector<2x4x16x16xf32>,
    return
  }
  func.func @transform_0(%arg0: i32) -> (i32, i32, i32, i32) {
    %c0_i32 = arith.constant 0 : i32
    %c0_i32_0 = arith.constant 0 : i32
    %c0_i32_1 = arith.constant 0 : i32
    %c0_i32_2 = arith.constant 0 : i32
    %c0_i32_3 = arith.constant 0 : i32
    return %c0_i32, %c0_i32_0, %c0_i32_1, %c0_i32_2 : i32, i32, i32, i32
  }
  func.func @transform_1(%arg0: i32) -> (i32, i32, i32, i32) {
    %c0_i32 = arith.constant 0 : i32
    %c0_i32_0 = arith.constant 0 : i32
    %c0_i32_1 = arith.constant 0 : i32
    %c0_i32_2 = arith.constant 0 : i32
    %c0_i32_3 = arith.constant 0 : i32
    return %c0_i32, %c0_i32_0, %c0_i32_1, %c0_i32_2 : i32, i32, i32, i32
  }
  func.func @transform_2(%arg0: i32) -> (i32, i32, i32, i32) {
    %c0_i32 = arith.constant 0 : i32
    %c0_i32_0 = arith.constant 0 : i32
    %c0_i32_1 = arith.constant 0 : i32
    %c0_i32_2 = arith.constant 0 : i32
    %c0_i32_3 = arith.constant 0 : i32
    return %c0_i32, %c0_i32_0, %c0_i32_1, %c0_i32_2 : i32, i32, i32, i32
  }
}

</mosaic_0001>

<bundles_post_ra>
// kernel: tpu_custom_call.1
= control target key start
LH: loop header
LB: loop body
LE: loop exit
PB: predicated region body
PF: predicated region fallthrough
CT: control target
= control target key end

     0   :  { %7 = vsyncpa [#allocation3], 0  ;;  %s647_s0 = inlined_call_operand.hbm [shape: f32[2,4,16,16], index: 0, kind: input, shape index: {}]   ;;  %s648_s1 = inlined_call_operand.vmem [shape: f32[1,5,1,1], index: 1, kind: input, shape index: {}]   ;;  %s649_s2 = inlined_call_operand.hbm [shape: f32[2,4,16,16], index: 2, kind: output, shape index: {}]  }
   0x1   :  { %8 = vsyncpa [#allocation4], 0  ;;  %s446_s9 = smov [#allocation2]   ;;  %s398_s13 = scalar_lea.hbm %s647_s0, 2048 }
   0x2   :  { %s14_s10 = sshll.u32 %s446_s9, 4  ;;  %p399_p0 = scmp.ne.s32.totalorder %s647_s0, %s398_s13  ;;  %s15_s10 = int_to_ptr.vmem [resolvable:$true] %s14_s10 }
   0x3   :  { %p402_p1 = scmp.lt.u32.totalorder %s398_s13, %s647_s0 }
   0x5   :  { %p404_p2 = pnand %p402_p1, %p399_p0 }
   0x7   :  { %407 = shalt.err (!%p404_p2)
}
   0x8   :  { %s408_s18 = scalar_lea.vmem %s15_s10, 2048  ;;  %p413_p4 = scmp.lt.s32.totalorder %s15_s10, %s15_s10 }
   0x9   :  { %p409_p3 = scmp.ne.s32.totalorder %s15_s10, %s408_s18  ;;  %p414_p5 = scmp.lt.s32.totalorder %s408_s18, %s408_s18 }
   0xb   :  { %p415_p6 = por %p414_p5, %p413_p4 }
   0xd   :  { %p416_p7 = pnand %p415_p6, %p409_p3 }
   0xf   :  { %419 = shalt.err (!%p416_p7)
}
  0x10   :  { %s447_s19 = smov 128   ;;  %s448_s20 = smov 8  }
  0x11   :  { %20 = dma.hbm_to_vmem [thread:$0]  %s647_s0, 2048, %s15_s10, [#allocation3], %s447_s19, %s447_s19, %s448_s20  }
  0x12   :  { %442 = dma.done.wait [#allocation3], 2048  }
  0x13   :  { %443 = vsyncadd [#allocation3], 4294965248  ;;  %v449_v0 = vmov 0   ;;  %v355_v1 = vld [vmem:[%s648_s1 + $0x2] ss:$0 sm:$0xff]  ;;  %vm47_vm0 = vcmask 130048  }
  0x14   :  { %369 = vset.pattern.permute.xlu1 %v449_v0  ;;  %368 = vset.pattern.permute.xlu0 %v449_v0  ;;  %v353_v2 = vld [vmem:[%s648_s1] ss:$0 sm:$0xff]  ;;  %v356_v3 = vld [vmem:[%s648_s1 + $0x3] ss:$0 sm:$0xff]  ;;  %v354_v4 = vld [vmem:[%s648_s1 + $0x1] ss:$0 sm:$0xff] }
  0x15   :  { %110 = vperm.xlu1 %369, %v355_v1   ;;  %102 = vperm.xlu0 %368, %v353_v2   ;;  %v357_v5 = vld [vmem:[%s648_s1 + $0x4] ss:$0 sm:$0xff]  ;;  %v498_v7 = vld [vmem:[#allocation2 + $0x8] sm:$0xff]  ;;  %v506_v11 = vld [vmem:[#allocation2 + $0x10] sm:$0xff]  ;;  %s450_s1 = smov [#allocation5]  }
  0x16   :  { %v496_v6 = vld [vmem:[#allocation2] sm:$0xff]  ;;  %v502_v9 = vld [vmem:[#allocation2 + $0x48] sm:$0xff]  ;;  %v55_v12 = vsel %vm47_vm0, %v498_v7, 0.0  ;;  %v514_v15 = vld [vmem:[#allocation2 + $0x18] sm:$0xff]  ;;  %v49_v18 = vsel %vm47_vm0, %v506_v11, 0.0  ;;  %s341_s4 = sshll.u32 %s450_s1, 4  ;;  %s342_s4 = int_to_ptr.vmem [resolvable:$true] %s341_s4 }
  0x17   :  { %v500_v8 = vld [vmem:[#allocation2 + $0x40] sm:$0xff]  ;;  %v48_v10 = vsel %vm47_vm0, %v496_v6, 0.0  ;;  %v69_v14 = vsel %vm47_vm0, %v502_v9, 0.0  ;;  %v516_v16 = vld [vmem:[#allocation2 + $0x50] sm:$0xff]  ;;  %v518_v17 = vld [vmem:[#allocation2 + $0x58] sm:$0xff]  ;;  %v56_v19 = vsel %vm47_vm0, %v514_v15, 0.0  ;;  %p425_p9 = scmp.lt.s32.totalorder %s342_s4, %s342_s4 }
  0x18   :  { %v62_v13 = vsel %vm47_vm0, %v500_v8, 0.0  ;;  %v63_v20 = vsel %vm47_vm0, %v516_v16, 0.0  ;;  %v70_v21 = vsel %vm47_vm0, %v518_v17, 0.0  ;;  %v528_v22 = vld [vmem:[#allocation2 + $0x20] sm:$0xff]  ;;  %v530_v23 = vld [vmem:[#allocation2 + $0x28] sm:$0xff]  ;;  %v50_v26 = vadd.f32 %v49_v18, %v48_v10  ;;  %v544_v34 = vld [vmem:[#allocation2 + $0x30] sm:$0xff] }
  0x19   :  { %114 = vperm.xlu1 %369, %v356_v3   ;;  %106 = vperm.xlu0 %368, %v354_v4   ;;  %v532_v24 = vld [vmem:[#allocation2 + $0x60] sm:$0xff]  ;;  %v534_v25 = vld [vmem:[#allocation2 + $0x68] sm:$0xff]  ;;  %v57_v27 = vadd.f32 %v56_v19, %v55_v12  ;;  %v64_v28 = vadd.f32 %v63_v20, %v62_v13  ;;  %v71_v29 = vadd.f32 %v70_v21, %v69_v14  ;;  %v51_v30 = vsel %vm47_vm0, %v528_v22, 0.0  ;;  %v546_v35 = vld [vmem:[#allocation2 + $0x38] sm:$0xff]  ;;  %s420_s5 = scalar_lea.vmem %s342_s4, 2048 }
  0x1a   :  { %v58_v31 = vsel %vm47_vm0, %v530_v23, 0.0  ;;  %v65_v32 = vsel %vm47_vm0, %v532_v24, 0.0  ;;  %v72_v33 = vsel %vm47_vm0, %v534_v25, 0.0  ;;  %v548_v36 = vld [vmem:[#allocation2 + $0x70] sm:$0xff]  ;;  %v550_v37 = vld [vmem:[#allocation2 + $0x78] sm:$0xff]  ;;  %v52_v38 = vadd.f32 %v51_v30, %v50_v26  ;;  %p421_p8 = scmp.ne.s32.totalorder %s342_s4, %s420_s5  ;;  %p426_p10 = scmp.lt.s32.totalorder %s420_s5, %s420_s5 }
  0x1b   :  { %v59_v39 = vadd.f32 %v58_v31, %v57_v27  ;;  %v66_v40 = vadd.f32 %v65_v32, %v64_v28  ;;  %v73_v41 = vadd.f32 %v72_v33, %v71_v29  ;;  %v53_v42 = vsel %vm47_vm0, %v544_v34, 0.0 }
  0x1c   :  { %v60_v43 = vsel %vm47_vm0, %v546_v35, 0.0  ;;  %v67_v44 = vsel %vm47_vm0, %v548_v36, 0.0  ;;  %v74_v45 = vsel %vm47_vm0, %v550_v37, 0.0  ;;  %v54_v46 = vadd.f32 %v53_v42, %v52_v38  ;;  %p427_p11 = por %p426_p10, %p425_p9 }
  0x1d   :  { %167 = vperm.xlu0 %368, %v357_v5   ;;  %v61_v47 = vadd.f32 %v60_v43, %v59_v39  ;;  %v68_v48 = vadd.f32 %v67_v44, %v66_v40  ;;  %v75_v49 = vadd.f32 %v74_v45, %v73_v41 }
  0x1e   :  { %v77_v56 = vmul.f32 0.25, %v54_v46  ;;  %p428_p12 = pnand %p427_p11, %p421_p8 }
  0x1f   :  { %v78_v57 = vmul.f32 0.25, %v61_v47  ;;  %v79_v58 = vmul.f32 0.25, %v68_v48  ;;  %v80_v59 = vmul.f32 0.25, %v75_v49 }
  0x94   :  { %v111_v50 = vpop.permute.xlu1 %110  ;;  %v103_v51 = vpop.permute.xlu0 %102 }
  0x95   :  { %v117_v52 = vmul.f32 %v103_v51, %v496_v6  ;;  %v118_v53 = vmul.f32 %v103_v51, %v498_v7  ;;  %v125_v54 = vmul.f32 %v103_v51, %v500_v8  ;;  %v126_v55 = vmul.f32 %v103_v51, %v502_v9 }
  0x96   :  { %v121_v60 = vmul.f32 %v111_v50, %v528_v22  ;;  %v122_v61 = vmul.f32 %v111_v50, %v530_v23  ;;  %v129_v62 = vmul.f32 %v111_v50, %v532_v24  ;;  %v130_v63 = vmul.f32 %v111_v50, %v534_v25 }
  0x97   :  { %v133_v2 = vsel %vm47_vm0, %v117_v52, 0.0  ;;  %v140_v3 = vsel %vm47_vm0, %v118_v53, 0.0  ;;  %v147_v4 = vsel %vm47_vm0, %v125_v54, 0.0  ;;  %v154_v5 = vsel %vm47_vm0, %v126_v55, 0.0 }
  0x98   :  { %v115_v0 = vpop.permute.xlu1 %114  ;;  %v107_v1 = vpop.permute.xlu0 %106  ;;  %v136_v38 = vsel %vm47_vm0, %v121_v60, 0.0  ;;  %v143_v39 = vsel %vm47_vm0, %v122_v61, 0.0  ;;  %v150_v40 = vsel %vm47_vm0, %v129_v62, 0.0  ;;  %v157_v41 = vsel %vm47_vm0, %v130_v63, 0.0 }
  0x99   :  { %v119_v10 = vmul.f32 %v107_v1, %v506_v11  ;;  %v120_v12 = vmul.f32 %v107_v1, %v514_v15  ;;  %v127_v13 = vmul.f32 %v107_v1, %v516_v16  ;;  %v128_v14 = vmul.f32 %v107_v1, %v518_v17 }
  0x9a   :  { %v123_v18 = vmul.f32 %v115_v0, %v544_v34  ;;  %v124_v19 = vmul.f32 %v115_v0, %v546_v35  ;;  %v131_v20 = vmul.f32 %v115_v0, %v548_v36  ;;  %v132_v21 = vmul.f32 %v115_v0, %v550_v37 }
  0x9b   :  { %v134_v26 = vsel %vm47_vm0, %v119_v10, 0.0  ;;  %v141_v27 = vsel %vm47_vm0, %v120_v12, 0.0  ;;  %v148_v28 = vsel %vm47_vm0, %v127_v13, 0.0  ;;  %v155_v29 = vsel %vm47_vm0, %v128_v14, 0.0 }
  0x9c   :  { %v135_v30 = vadd.f32 %v134_v26, %v133_v2  ;;  %v142_v31 = vadd.f32 %v141_v27, %v140_v3  ;;  %v149_v32 = vadd.f32 %v148_v28, %v147_v4  ;;  %v156_v33 = vadd.f32 %v155_v29, %v154_v5  ;;  %v168_v54 = vpop.permute.xlu0 %167 }
  0x9d   :  { %v138_v46 = vsel %vm47_vm0, %v123_v18, 0.0  ;;  %v145_v47 = vsel %vm47_vm0, %v124_v19, 0.0  ;;  %v152_v48 = vsel %vm47_vm0, %v131_v20, 0.0  ;;  %v159_v49 = vsel %vm47_vm0, %v132_v21, 0.0 }
  0x9e   :  { %v137_v42 = vadd.f32 %v136_v38, %v135_v30  ;;  %v144_v43 = vadd.f32 %v143_v39, %v142_v31  ;;  %v151_v44 = vadd.f32 %v150_v40, %v149_v32  ;;  %v158_v45 = vadd.f32 %v157_v41, %v156_v33 }
  0xa0   :  { %v139_v50 = vadd.f32 %v138_v46, %v137_v42  ;;  %v146_v51 = vadd.f32 %v145_v47, %v144_v43  ;;  %v153_v52 = vadd.f32 %v152_v48, %v151_v44  ;;  %v160_v53 = vadd.f32 %v159_v49, %v158_v45 }
  0xa2   :  { %v170_v55 = vadd.f32 %v168_v54, %v139_v50  ;;  %v171_v60 = vadd.f32 %v168_v54, %v146_v51  ;;  %v172_v61 = vadd.f32 %v168_v54, %v153_v52  ;;  %v173_v62 = vadd.f32 %v168_v54, %v160_v53 }
  0xa4   :  { %v174_v63 = vsub.f32 %v170_v55, %v77_v56  ;;  %v175_v0 = vsub.f32 %v171_v60, %v78_v57  ;;  %v176_v1 = vsub.f32 %v172_v61, %v79_v58  ;;  %v177_v2 = vsub.f32 %v173_v62, %v80_v59 }
  0xa6   :  { %v178_v3 = vsel %vm47_vm0, %v174_v63, -inf  ;;  %v179_v4 = vsel %vm47_vm0, %v176_v1, -inf  ;;  %v181_v5 = vsel %vm47_vm0, %v175_v0, -inf  ;;  %v182_v10 = vsel %vm47_vm0, %v177_v2, -inf }
  0xa7   :  { %v180_v12 = vmax.f32 %v178_v3, %v179_v4  ;;  %v183_v13 = vmax.f32 %v181_v5, %v182_v10 }
  0xa9   :  { %v184_v14 = vsub.f32 %v174_v63, %v180_v12  ;;  %v185_v18 = vsub.f32 %v175_v0, %v183_v13  ;;  %v186_v19 = vsub.f32 %v176_v1, %v180_v12  ;;  %v187_v20 = vsub.f32 %v177_v2, %v183_v13 }
  0xab   :  { %v188_v21 = vmul.f32 1.442695, %v184_v14  ;;  %v190_v26 = vmul.f32 1.442695, %v185_v18  ;;  %v192_v56 = vmul.f32 1.442695, %v186_v19 }
  0xac   :  { %v194_v57 = vmul.f32 1.442695, %v187_v20 }
  0xad   :  { %370 = vpow2.f32 %v188_v21 }
  0xae   :  { %372 = vpow2.f32 %v190_v26 }
  0xaf   :  { %374 = vpow2.f32 %v192_v56 }
  0xb0   :  { %376 = vpow2.f32 %v194_v57 }
  0xb7   :  { %v371_v58 = vpop.eup %370 }
  0xb8   :  { %v373_v59 = vpop.eup %372  ;;  %v196_v27 = vsel %vm47_vm0, %v371_v58, 0.0 }
  0xb9   :  { %v375_v28 = vpop.eup %374  ;;  %v199_v29 = vsel %vm47_vm0, %v373_v59, 0.0 }
  0xba   :  { %v377_v30 = vpop.eup %376  ;;  %v197_v31 = vsel %vm47_vm0, %v375_v28, 0.0 }
  0xbb   :  { %v198_v32 = vadd.f32 %v197_v31, %v196_v27  ;;  %v200_v33 = vsel %vm47_vm0, %v377_v30, 0.0 }
  0xbc   :  { %v201_v38 = vadd.f32 %v200_v33, %v199_v29 }
  0xbd   :  { %378 = vrcp.f32 %v198_v32 }
  0xbe   :  { %380 = vrcp.f32 %v201_v38 }
  0xc7   :  { %v379_v39 = vpop.eup %378 }
  0xc8   :  { %v381_v40 = vpop.eup %380  ;;  %v203_v41 = vmul.f32 %v379_v39, %v371_v58  ;;  %v206_v42 = vmul.f32 %v379_v39, %v375_v28 }
  0xc9   :  { %v205_v43 = vmul.f32 %v381_v40, %v373_v59  ;;  %v207_v44 = vmul.f32 %v381_v40, %v377_v30 }
  0xca   :  { %v208_v45 = vmul.f32 %v203_v41, %v170_v55  ;;  %v210_v46 = vmul.f32 %v206_v42, %v172_v61 }
  0xcb   :  { %v209_v47 = vmul.f32 %v205_v43, %v171_v60  ;;  %v211_v48 = vmul.f32 %v207_v44, %v173_v62 }
  0xcc   :  { %v212_v49 = vadd.f32 %v208_v45, %v170_v55  ;;  %v214_v50 = vadd.f32 %v210_v46, %v172_v61 }
  0xcd   :  { %v213_v51 = vadd.f32 %v209_v47, %v171_v60  ;;  %v215_v52 = vadd.f32 %v211_v48, %v173_v62 }
  0xce   :  { %v358_v53 = vmul.f32 -1.442695, %v212_v49  ;;  %v360_v54 = vmul.f32 -1.442695, %v214_v50 }
  0xcf   :  { %v359_v63 = vmul.f32 -1.442695, %v213_v51  ;;  %v361_v0 = vmul.f32 -1.442695, %v215_v52 }
  0xd0   :  { %382 = vpow2.f32 %v358_v53 }
  0xd1   :  { %384 = vpow2.f32 %v359_v63 }
  0xd2   :  { %386 = vpow2.f32 %v360_v54 }
  0xd3   :  { %388 = vpow2.f32 %v361_v0 }
  0xda   :  { %v383_v1 = vpop.eup %382 }
  0xdb   :  { %v385_v2 = vpop.eup %384  ;;  %v228_v3 = vadd.f32 1.0, %v383_v1 }
  0xdc   :  { %v387_v4 = vpop.eup %386  ;;  %v229_v10 = vadd.f32 1.0, %v385_v2 }
  0xdd   :  { %v389_v5 = vpop.eup %388  ;;  %v230_v12 = vadd.f32 1.0, %v387_v4  ;;  %390 = vrcp.f32 %v228_v3 }
  0xde   :  { %v231_v55 = vadd.f32 1.0, %v389_v5 }
  0xdf   :  { %392 = vrcp.f32 %v230_v12 }
  0xe0   :  { %394 = vrcp.f32 %v229_v10 }
  0xe1   :  { %396 = vrcp.f32 %v231_v55 }
  0xe7   :  { %v391_v60 = vpop.eup %390 }
  0xe8   :  { %240 = vxpose.xlu1.b32.start [1/2] (short) (narrow) %v391_v60, 16 }
  0xe9   :  { %v393_v61 = vpop.eup %392 }
  0xea   :  { %272 = vxpose.xlu0.b32.start [1/2] (short) (narrow) %v393_v61, 16  ;;  %v395_v62 = vpop.eup %394 }
  0xeb   :  { %v397_v13 = vpop.eup %396 }
  0xec   :  { %241 = vxpose.xlu1.b32.end [2/2] (short) (narrow) %v395_v62, 16 }
  0xee   :  { %273 = vxpose.xlu0.b32.end [2/2] (short) (narrow) %v397_v13, 16 }
 0x168   :  { %v256_v14 = vpop.trf.xlu1 }
 0x169   :  { %v304_v18 = vmul.f32 %v256_v14, %v496_v6  ;;  %v306_v19 = vmul.f32 %v256_v14, %v506_v11  ;;  %v308_v20 = vmul.f32 %v256_v14, %v528_v22  ;;  %v310_v21 = vmul.f32 %v256_v14, %v544_v34 }
 0x16a   :  { %v288_v26 = vpop.trf.xlu0 }
 0x16b   :  { %v312_v56 = vmul.f32 %v288_v26, %v500_v8  ;;  %v314_v57 = vmul.f32 %v288_v26, %v516_v16  ;;  %v316_v58 = vmul.f32 %v288_v26, %v532_v24  ;;  %v318_v59 = vmul.f32 %v288_v26, %v548_v36  ;;  %320 = vst.msk [vmem:[#allocation5] sm:$0xff] %vm47_vm0, %v304_v18 }
 0x16c   :  { %322 = vst.msk [vmem:[#allocation5 + $0x10] sm:$0xff] %vm47_vm0, %v306_v19  ;;  %324 = vst.msk [vmem:[#allocation5 + $0x20] sm:$0xff] %vm47_vm0, %v308_v20  ;;  %v257_v6 = vpop.trf.xlu1 }
 0x16d   :  { %326 = vst.msk [vmem:[#allocation5 + $0x30] sm:$0xff] %vm47_vm0, %v310_v21  ;;  %328 = vst.msk [vmem:[#allocation5 + $0x40] sm:$0xff] %vm47_vm0, %v312_v56  ;;  %v305_v8 = vmul.f32 %v257_v6, %v498_v7  ;;  %v307_v11 = vmul.f32 %v257_v6, %v514_v15  ;;  %v309_v16 = vmul.f32 %v257_v6, %v530_v23 }
 0x16e   :  { %330 = vst.msk [vmem:[#allocation5 + $0x50] sm:$0xff] %vm47_vm0, %v314_v57  ;;  %332 = vst.msk [vmem:[#allocation5 + $0x60] sm:$0xff] %vm47_vm0, %v316_v58  ;;  %v311_v22 = vmul.f32 %v257_v6, %v546_v35  ;;  %v289_v24 = vpop.trf.xlu0 }
 0x16f   :  { %334 = vst.msk [vmem:[#allocation5 + $0x70] sm:$0xff] %vm47_vm0, %v318_v59  ;;  %v313_v34 = vmul.f32 %v289_v24, %v502_v9  ;;  %v315_v36 = vmul.f32 %v289_v24, %v518_v17  ;;  %v317_v27 = vmul.f32 %v289_v24, %v534_v25  ;;  %v319_v28 = vmul.f32 %v289_v24, %v550_v37 }
 0x170   :  { %321 = vst.msk [vmem:[#allocation5 + $0x8] sm:$0xff] %vm47_vm0, %v305_v8  ;;  %323 = vst.msk [vmem:[#allocation5 + $0x18] sm:$0xff] %vm47_vm0, %v307_v11 }
 0x171   :  { %325 = vst.msk [vmem:[#allocation5 + $0x28] sm:$0xff] %vm47_vm0, %v309_v16  ;;  %327 = vst.msk [vmem:[#allocation5 + $0x38] sm:$0xff] %vm47_vm0, %v311_v22 }
 0x172   :  { %329 = vst.msk [vmem:[#allocation5 + $0x48] sm:$0xff] %vm47_vm0, %v313_v34  ;;  %331 = vst.msk [vmem:[#allocation5 + $0x58] sm:$0xff] %vm47_vm0, %v315_v36 }
 0x173   :  { %333 = vst.msk [vmem:[#allocation5 + $0x68] sm:$0xff] %vm47_vm0, %v317_v27  ;;  %335 = vst.msk [vmem:[#allocation5 + $0x78] sm:$0xff] %vm47_vm0, %v319_v28 }
 0x174   :  { %431 = shalt.err (!%p428_p12)
}
 0x175   :  { %s432_s8 = scalar_lea.hbm %s649_s2, 2048 }
 0x176   :  { %p433_p13 = scmp.ne.s32.totalorder %s649_s2, %s432_s8  ;;  %p436_p0 = scmp.lt.u32.totalorder %s432_s8, %s649_s2 }
 0x178   :  { %p438_p1 = pnand %p436_p0, %p433_p13 }
 0x17a   :  { %441 = shalt.err (!%p438_p1)
}
 0x17b   :  { %347 = dma.vmem_to_hbm [thread:$0]  %s342_s4, 2048, %s649_s2, [#allocation4], %s447_s19, %s447_s19, %s448_s20  }
 0x17c   :  { %444 = dma.done.wait [#allocation4], 2048  }
 0x17d   :  { %445 = vsyncadd [#allocation4], 4294965248 }
 0x17e   :  { %351 = vsyncpa [#allocation3], 1 }
 0x17f   :  { %352 = vsyncpa [#allocation4], 1 }

</bundles_post_ra>
